<compile_context>
chip_gen: v5e
topology: v5e:2x2
jax: 0.10.0
libtpu: 0.0.40
codegen_flags: <defaults>
</compile_context>

<pallas_src>
import functools

import jax
import jax.numpy as jnp
from jax.experimental import pallas as pl
from jax.experimental.pallas import tpu as pltpu

EPS = 1e-5  # torch.nn.BatchNorm2d default

VMEM_LIMIT_BYTES = 32 * 1024 * 1024     # explicit; fits every TPU generation
_LANE_TILE_CAP = 2048                   # lane tile target (multiple of 128)
_PER_BUFFER_BYTES = 4 * 1024 * 1024     # keep 4 live tile buffers <= 16 MiB


# --------------------------------------------------------------------------
# Pass 1: per-channel streaming stats -> (scale, shift)
# --------------------------------------------------------------------------
def _stats_kernel(x_ref, w_ref, b_ref, scale_ref, shift_ref,
                  sum_acc, sq_acc, *, inv_count):
    # x_ref: (1, Ct, HWt) block; w/b/scale/shift: (Ct, 1); scratch: (Ct, 1) f32
    n = pl.program_id(1)
    hw = pl.program_id(2)

    @pl.when((n == 0) & (hw == 0))
    def _init():
        sum_acc[...] = jnp.zeros_like(sum_acc)
        sq_acc[...] = jnp.zeros_like(sq_acc)

    x = x_ref[0].astype(jnp.float32)                       # (Ct, HWt)
    sum_acc[...] += jnp.sum(x, axis=1, keepdims=True)      # (Ct, 1)
    sq_acc[...] += jnp.sum(x * x, axis=1, keepdims=True)   # (Ct, 1)

    @pl.when((n == pl.num_programs(1) - 1) & (hw == pl.num_programs(2) - 1))
    def _finalize():
        mean = sum_acc[...] * inv_count
        # biased variance (training-mode normalization); clamp for the
        # E[x^2] - mean^2 cancellation case.
        var = jnp.maximum(sq_acc[...] * inv_count - mean * mean, 0.0)
        scale = w_ref[...].astype(jnp.float32) * jax.lax.rsqrt(var + EPS)
        scale_ref[...] = scale
        shift_ref[...] = b_ref[...].astype(jnp.float32) - mean * scale


# --------------------------------------------------------------------------
# Pass 2: normalize with precombined affine:  y = x * scale + shift
# --------------------------------------------------------------------------
def _norm_kernel(x_ref, scale_ref, shift_ref, o_ref):
    x = x_ref[0].astype(jnp.float32)                       # (Ct, HWt)
    y = x * scale_ref[...] + shift_ref[...]                # broadcast (Ct, 1)
    o_ref[0] = y.astype(o_ref.dtype)


# --------------------------------------------------------------------------
# Tile selection
# --------------------------------------------------------------------------
def _pick_lane_tile(hw_total, cap=_LANE_TILE_CAP):
    """Largest multiple of 128 that divides hw_total and is <= cap, else full."""
    best = None
    t = 128
    while t <= min(hw_total, cap):
        if hw_total % t == 0:
            best = t
        t += 128
    return best if best is not None else hw_total


def _pick_channel_tile(c_total, hwt, itemsize):
    """Divisor of C, a multiple of 8 (sublane-dense) when possible, tile-budgeted."""
    if c_total <= 8:
        return c_total
    per_elem = max(itemsize, 4)
    best = None
    t = 8
    while t <= c_total:
        if c_total % t == 0 and t * hwt * per_elem <= _PER_BUFFER_BYTES:
            best = t
        t += 8
    if best is not None:
        return best
    return 8 if c_total % 8 == 0 else c_total


# --------------------------------------------------------------------------
# Wrapper (forward of AdaptiveBatchNorm)
# --------------------------------------------------------------------------
def adaptive_batch_norm(x_nchw, weights, biases, domain, affine_domain=None):
    """weights/biases: (num_domains, C). domain: python int selecting the BN."""
    N, C, H, W = x_nchw.shape
    HW = H * W

    # set_affine_params(): every domain's affine params are tied to
    # affine_domain's weight/bias when affine_domain is set.
    if affine_domain is not None:
        w_sel, b_sel = weights[affine_domain], biases[affine_domain]
    else:
        w_sel, b_sel = weights[domain], biases[domain]
    w = w_sel.reshape(C, 1).astype(jnp.float32)
    b = b_sel.reshape(C, 1).astype(jnp.float32)

    # NCHW -> (N, C, H*W): contiguous reshape, no transpose / extra HBM pass.
    x3d = x_nchw.reshape(N, C, HW)

    itemsize = jnp.dtype(x_nchw.dtype).itemsize
    HWt = _pick_lane_tile(HW)
    Ct = _pick_channel_tile(C, HWt, itemsize)
    grid = (C // Ct, N, HW // HWt)          # reduction axes (N, HW) last

    x_spec = pl.BlockSpec((1, Ct, HWt), lambda c, n, hw: (n, c, hw))
    chan_spec = pl.BlockSpec((Ct, 1), lambda c, n, hw: (c, 0))

    # ---- pass 1: per-channel scale / shift -------------------------------
    scale, shift = pl.pallas_call(
        functools.partial(_stats_kernel, inv_count=1.0 / float(N * HW)),
        out_shape=(jax.ShapeDtypeStruct((C, 1), jnp.float32),
                   jax.ShapeDtypeStruct((C, 1), jnp.float32)),
        grid_spec=pltpu.PrefetchScalarGridSpec(
            num_scalar_prefetch=0,
            grid=grid,
            in_specs=[x_spec, chan_spec, chan_spec],
            out_specs=[chan_spec, chan_spec],
            scratch_shapes=[pltpu.VMEM((Ct, 1), jnp.float32),
                            pltpu.VMEM((Ct, 1), jnp.float32)]),
        compiler_params=pltpu.CompilerParams(
            dimension_semantics=("parallel", "arbitrary", "arbitrary"),
            vmem_limit_bytes=VMEM_LIMIT_BYTES),
    )(x3d, w, b)

    # ---- pass 2: normalize (single FMA per element) ----------------------
    out3d = pl.pallas_call(
        _norm_kernel,
        out_shape=jax.ShapeDtypeStruct((N, C, HW), x_nchw.dtype),
        grid_spec=pltpu.PrefetchScalarGridSpec(
            num_scalar_prefetch=0,
            grid=grid,
            in_specs=[x_spec, chan_spec, chan_spec],
            out_specs=x_spec),
        compiler_params=pltpu.CompilerParams(
            dimension_semantics=("parallel", "parallel", "parallel"),
            vmem_limit_bytes=VMEM_LIMIT_BYTES),
    )(x3d, scale, shift)

    # (N, C, H*W) -> NCHW: contiguous reshape again, no transpose.
    return out3d.reshape(N, C, H, W)


# --------------------------------------------------------------------------
# Pure-JAX reference
# --------------------------------------------------------------------------
def _reference(x_nchw, w, b):
    xf = x_nchw.astype(jnp.float32)
    mean = jnp.mean(xf, axis=(0, 2, 3), keepdims=True)
    var = jnp.mean((xf - mean) ** 2, axis=(0, 2, 3), keepdims=True)
    y = (xf - mean) * jax.lax.rsqrt(var + EPS)
    return y * w.reshape(1, -1, 1, 1) + b.reshape(1, -1, 1, 1)


if __name__ == "__main__":
    key = jax.random.PRNGKey(0)
    k_x, k_w, k_b = jax.random.split(key, 3)

    N, C, H, W = 2, 4, 16, 16
    num_domains = 2
    affine_domain = 0   # all domains share domain-0's affine params
    domain = 1          # use the domain-1 BatchNorm (batch stats are the same math)

    x = jax.random.normal(k_x, (N, C, H, W), dtype=jnp.float32)
    # Deterministic non-trivial affine params (torch default would be w=1, b=0).
    weights = 1.0 + 0.1 * jax.random.normal(k_w, (num_domains, C), dtype=jnp.float32)
    biases = 0.1 * jax.random.normal(k_b, (num_domains, C), dtype=jnp.float32)

    # TODO(synk): running_mean/running_var buffer updates are stateful module
    # state and are not modeled (training-mode output does not depend on them).

    out = adaptive_batch_norm(x, weights, biases, domain, affine_domain=affine_domain)
    out = jax.block_until_ready(out)

    ref = _reference(x, weights[affine_domain], biases[affine_domain])
    assert out.shape == x.shape and out.dtype == x.dtype
    assert jnp.max(jnp.abs(out - ref)) < 1e-4

    print("KERNEL_OK")
</pallas_src>

<mosaic_0001>
module attributes {stable_mosaic.version = 11 : i64} {
  func.func @_stats_kernel(%arg0: i32, %arg1: i32, %arg2: i32, %arg3: memref<1x4x256xf32, #tpu.memory_space<vmem>>, %arg4: memref<4x1xf32, #tpu.memory_space<vmem>>, %arg5: memref<4x1xf32, #tpu.memory_space<vmem>>, %arg6: memref<4x1xf32, #tpu.memory_space<vmem>>, %arg7: memref<4x1xf32, #tpu.memory_space<vmem>>, %arg8: memref<4x1xf32, #tpu.memory_space<vmem>>, %arg9: memref<4x1xf32, #tpu.memory_space<vmem>>) attributes {dimension_semantics = [#tpu.dimension_semantics<parallel>, #tpu.dimension_semantics<arbitrary>, #tpu.dimension_semantics<arbitrary>], iteration_bounds = array<i64: 1, 2, 1>, scalar_prefetch = 0 : i64, scratch_operands = 2 : i64, tpu.core_type = #tpu.core_type<tc>, window_params = [{transform_indices = @transform_0, window_bounds = array<i64: 1, 4, 256>}, {transform_indices = @transform_1, window_bounds = array<i64: 4, 1>}, {transform_indices = @transform_2, window_bounds = array<i64: 4, 1>}, {transform_indices = @transform_3, window_bounds = array<i64: 4, 1>}, {transform_indices = @transform_4, window_bounds = array<i64: 4, 1>}]} {
    %c0_i32 = arith.constant 0 : i32
    %0 = arith.cmpi eq, %arg1, %c0_i32 : i32
    %c0_i32_0 = arith.constant 0 : i32
    %1 = arith.cmpi eq, %arg2, %c0_i32_0 : i32
    %2 = arith.andi %0, %1 : i1
    %3 = arith.extui %2 : i1 to i32
    %c0_i32_1 = arith.constant 0 : i32
    %4 = arith.cmpi ne, %3, %c0_i32_1 : i32
    scf.if %4 {
      %cst_15 = arith.constant 0.000000e+00 : f32
      %23 = vector.broadcast %cst_15 : f32 to vector<4x1xf32>
      %c0_16 = arith.constant 0 : index
      %c0_17 = arith.constant 0 : index
      %24 = vector.load %arg8[%c0_16, %c0_17] : memref<4x1xf32, #tpu.memory_space<vmem>>, vector<4x1xf32>
      tpu.vector_store %arg8[%c0_16, %c0_17], %23 {strides = array<i32>} : memref<4x1xf32, #tpu.memory_space<vmem>>, vector<4x1xf32>,
      %cst_18 = arith.constant 0.000000e+00 : f32
      %25 = vector.broadcast %cst_18 : f32 to vector<4x1xf32>
      %c0_19 = arith.constant 0 : index
      %c0_20 = arith.constant 0 : index
      %26 = vector.load %arg9[%c0_19, %c0_20] : memref<4x1xf32, #tpu.memory_space<vmem>>, vector<4x1xf32>
      tpu.vector_store %arg9[%c0_19, %c0_20], %25 {strides = array<i32>} : memref<4x1xf32, #tpu.memory_space<vmem>>, vector<4x1xf32>,
    } else {
    }
    %c0 = arith.constant 0 : index
    %c0_2 = arith.constant 0 : index
    %c0_3 = arith.constant 0 : index
    %5 = vector.load %arg3[%c0, %c0_2, %c0_3] : memref<1x4x256xf32, #tpu.memory_space<vmem>>, vector<1x4x256xf32>
    %6 = vector.shape_cast %5 : vector<1x4x256xf32> to vector<4x256xf32>
    %c0_4 = arith.constant 0 : index
    %c0_5 = arith.constant 0 : index
    %7 = vector.load %arg8[%c0_4, %c0_5] : memref<4x1xf32, #tpu.memory_space<vmem>>, vector<4x1xf32>
    %cst = arith.constant dense<0.000000e+00> : vector<4xf32>
    %8 = vector.multi_reduction <add>, %6, %cst [1] : vector<4x256xf32> to vector<4xf32>
    %9 = vector.shape_cast %8 : vector<4xf32> to vector<4x1xf32>
    %10 = arith.addf %7, %9 : vector<4x1xf32>
    %c0_6 = arith.constant 0 : index
    %c0_7 = arith.constant 0 : index
    %11 = vector.load %arg8[%c0_6, %c0_7] : memref<4x1xf32, #tpu.memory_space<vmem>>, vector<4x1xf32>
    tpu.vector_store %arg8[%c0_6, %c0_7], %10 {strides = array<i32>} : memref<4x1xf32, #tpu.memory_space<vmem>>, vector<4x1xf32>,
    %c0_8 = arith.constant 0 : index
    %c0_9 = arith.constant 0 : index
    %12 = vector.load %arg9[%c0_8, %c0_9] : memref<4x1xf32, #tpu.memory_space<vmem>>, vector<4x1xf32>
    %13 = arith.mulf %6, %6 : vector<4x256xf32>
    %cst_10 = arith.constant dense<0.000000e+00> : vector<4xf32>
    %14 = vector.multi_reduction <add>, %13, %cst_10 [1] : vector<4x256xf32> to vector<4xf32>
    %15 = vector.shape_cast %14 : vector<4xf32> to vector<4x1xf32>
    %16 = arith.addf %12, %15 : vector<4x1xf32>
    %c0_11 = arith.constant 0 : index
    %c0_12 = arith.constant 0 : index
    %17 = vector.load %arg9[%c0_11, %c0_12] : memref<4x1xf32, #tpu.memory_space<vmem>>, vector<4x1xf32>
    tpu.vector_store %arg9[%c0_11, %c0_12], %16 {strides = array<i32>} : memref<4x1xf32, #tpu.memory_space<vmem>>, vector<4x1xf32>,
    %c1_i32 = arith.constant 1 : i32
    %18 = arith.cmpi eq, %arg1, %c1_i32 : i32
    %c0_i32_13 = arith.constant 0 : i32
    %19 = arith.cmpi eq, %arg2, %c0_i32_13 : i32
    %20 = arith.andi %18, %19 : i1
    %21 = arith.extui %20 : i1 to i32
    %c0_i32_14 = arith.constant 0 : i32
    %22 = arith.cmpi ne, %21, %c0_i32_14 : i32
    scf.if %22 {
      %c0_15 = arith.constant 0 : index
      %c0_16 = arith.constant 0 : index
      %23 = vector.load %arg8[%c0_15, %c0_16] : memref<4x1xf32, #tpu.memory_space<vmem>>, vector<4x1xf32>
      %cst_17 = arith.constant 0.001953125 : f32
      %24 = vector.broadcast %cst_17 : f32 to vector<4x1xf32>
      %25 = arith.mulf %23, %24 : vector<4x1xf32>
      %c0_18 = arith.constant 0 : index
      %c0_19 = arith.constant 0 : index
      %26 = vector.load %arg9[%c0_18, %c0_19] : memref<4x1xf32, #tpu.memory_space<vmem>>, vector<4x1xf32>
      %cst_20 = arith.constant 0.001953125 : f32
      %27 = vector.broadcast %cst_20 : f32 to vector<4x1xf32>
      %28 = arith.mulf %26, %27 : vector<4x1xf32>
      %29 = arith.mulf %25, %25 : vector<4x1xf32>
      %30 = arith.subf %28, %29 : vector<4x1xf32>
      %cst_21 = arith.constant 0.000000e+00 : f32
      %31 = vector.broadcast %cst_21 : f32 to vector<4x1xf32>
      %32 = arith.maximumf %30, %31 : vector<4x1xf32>
      %c0_22 = arith.constant 0 : index
      %c0_23 = arith.constant 0 : index
      %33 = vector.load %arg4[%c0_22, %c0_23] : memref<4x1xf32, #tpu.memory_space<vmem>>, vector<4x1xf32>
      %cst_24 = arith.constant 9.99999974E-6 : f32
      %34 = vector.broadcast %cst_24 : f32 to vector<4x1xf32>
      %35 = arith.addf %32, %34 : vector<4x1xf32>
      %36 = math.rsqrt %35 : vector<4x1xf32>
      %37 = arith.mulf %33, %36 : vector<4x1xf32>
      %c0_25 = arith.constant 0 : index
      %c0_26 = arith.constant 0 : index
      %38 = vector.load %arg6[%c0_25, %c0_26] : memref<4x1xf32, #tpu.memory_space<vmem>>, vector<4x1xf32>
      tpu.vector_store %arg6[%c0_25, %c0_26], %37 {strides = array<i32>} : memref<4x1xf32, #tpu.memory_space<vmem>>, vector<4x1xf32>,
      %c0_27 = arith.constant 0 : index
      %c0_28 = arith.constant 0 : index
      %39 = vector.load %arg5[%c0_27, %c0_28] : memref<4x1xf32, #tpu.memory_space<vmem>>, vector<4x1xf32>
      %40 = arith.mulf %25, %37 : vector<4x1xf32>
      %41 = arith.subf %39, %40 : vector<4x1xf32>
      %c0_29 = arith.constant 0 : index
      %c0_30 = arith.constant 0 : index
      %42 = vector.load %arg7[%c0_29, %c0_30] : memref<4x1xf32, #tpu.memory_space<vmem>>, vector<4x1xf32>
      tpu.vector_store %arg7[%c0_29, %c0_30], %41 {strides = array<i32>} : memref<4x1xf32, #tpu.memory_space<vmem>>, vector<4x1xf32>,
    } else {
    }
    return
  }
  func.func @transform_0(%arg0: i32, %arg1: i32, %arg2: i32) -> (i32, i32, i32) {
    %c0_i32 = arith.constant 0 : i32
    return %arg1, %arg0, %arg2 : i32, i32, i32
  }
  func.func @transform_1(%arg0: i32, %arg1: i32, %arg2: i32) -> (i32, i32) {
    %c0_i32 = arith.constant 0 : i32
    %c0_i32_0 = arith.constant 0 : i32
    return %arg0, %c0_i32 : i32, i32
  }
  func.func @transform_2(%arg0: i32, %arg1: i32, %arg2: i32) -> (i32, i32) {
    %c0_i32 = arith.constant 0 : i32
    %c0_i32_0 = arith.constant 0 : i32
    return %arg0, %c0_i32 : i32, i32
  }
  func.func @transform_3(%arg0: i32, %arg1: i32, %arg2: i32) -> (i32, i32) {
    %c0_i32 = arith.constant 0 : i32
    %c0_i32_0 = arith.constant 0 : i32
    return %arg0, %c0_i32 : i32, i32
  }
  func.func @transform_4(%arg0: i32, %arg1: i32, %arg2: i32) -> (i32, i32) {
    %c0_i32 = arith.constant 0 : i32
    %c0_i32_0 = arith.constant 0 : i32
    return %arg0, %c0_i32 : i32, i32
  }
}

</mosaic_0001>

<bundles_post_ra>
// kernel: tpu_custom_call.1
= control target key start
LH: loop header
LB: loop body
LE: loop exit
PB: predicated region body
PF: predicated region fallthrough
CT: control target
= control target key end

     0   :  { %10 = vsyncpa [#allocation5], 0  ;;  %s784_s0 = inlined_call_operand.hbm [shape: f32[2,4,256], index: 0, kind: input, shape index: {}]   ;;  %s785_s1 = inlined_call_operand.vmem [shape: f32[4,1], index: 1, kind: input, shape index: {}]   ;;  %s786_s2 = inlined_call_operand.vmem [shape: f32[4,1], index: 2, kind: input, shape index: {}]   ;;  %s787_s3 = inlined_call_operand.vmem [shape: f32[4,1], index: 3, kind: output, shape index: {0}]   ;;  %s788_s4 = inlined_call_operand.vmem [shape: f32[4,1], index: 4, kind: output, shape index: {1}]  }
   0x1   :  { %12 = vsyncpa [#allocation5 + $0x1], 0  ;;  %s681_s15 = smov 0   ;;  %s683_s16 = smov 0  }
   0x2   :  { %s685_s17 = smov 0   ;;  %s687_s18 = smov 0  }
   0x3   :  { %s689_s19 = smov 0   ;;  %s691_s20 = smov 0  }
   0x4 LB: > { %s496_s21 = sadd.s32 4294967295, %s653_s20   ;;  %s33_s22 = sadd.s32 1, %s649_s19  ;;  %s653_s20 = sphi %s691_s20, %s18_s20   ;;  %s649_s19 = sphi %s689_s19, %s795_s19   ;;  %s645_s18 = sphi %s687_s18, %s794_s18   ;;  %s641_s17 = sphi %s685_s17, %s793_s17   ;;  %s637_s16 = sphi %s683_s16, %s792_s16   ;;  %s633_s15 = sphi %s681_s15, %s791_s15  }
   0x5   : > { %p35_p0 = scmp.ge.s32.totalorder %s33_s22, 2  ;;  %s48_s23 = sadd.s32 1, %s641_s17 }
   0x6   : > { %p55_p1 = scmp.ne.s32.totalorder %s641_s17, %s637_s16  ;;  %p56_p2 = scmp.eq.s32.totalorder %s653_s20, 0 }
   0x7   : > { %s797_s22 = smov (%p35_p0, %s33_s22), 0  ;;  %p61_p4 = scmp.ne.s32.totalorder %s637_s16, %s633_s15 }
   0x8   : > { %p717_p3 = por %p56_p2, %p55_p1  ;;  %s41_s25 = ssub.s32 %s649_s19, %s797_s22 }
   0x9   : > { %p62_p5 = scmp.eq.s32.totalorder %s496_s21, 0  ;;  %p46_p6 = scmp.eq.s32.totalorder %s41_s25, 0 }
   0xa   : > { %p521_p8 = scmp.lt.s32.totalorder %s653_s20, 2  ;;  %s203_s28 = sand.u32 1, %s641_s17  }
   0xb   : > { %p724_p7 = por %p62_p5, %p61_p4  ;;  %s512_s29 = sshll.u32 %s649_s19, 3 }
   0xc   : > { %s730_s27 = scalar_select %p46_p6, %s641_s17, %s48_s23  }
   0xd   : > { %s501_s30 = sshll.u32 %s203_s28, 3  ;;  %s216_s7 = scalar_lea.hbm %s784_s0, %s512_s29 }
   0xe   : > { %s218_s8 = sshll.u32 %s216_s7, 4  ;;  %s207_s9 = scalar_lea.vmem [#allocation4], %s501_s30  ;;  %s219_s8 = int_to_ptr.hbm [resolvable:$true] %s218_s8 }
   0xf   : > { %s220_s10 = sshll.u32 %s207_s9, 4  ;;  %p518_p9 = pnand %p521_p8, %p717_p3  ;;  %s221_s10 = int_to_ptr.vmem [resolvable:$true] %s220_s10 }
  0x10   : > { %p504_p10 = scmp.ge.s32.totalorder %s653_s20, 1  ;;  %p225_p11 = scmp.lt.s32.totalorder %s653_s20, 3 }
  0x11   : > { %s204_s11 = scalar_lea.sflag [#allocation5], %s203_s28 }
  0x12   : > { %520 = dma.hbm_to_vmem [thread:$0]  (!%p518_p9), %s219_s8, 128, %s221_s10, %s204_s11  }
  0x13   : > { %p226_p12 = pnand %p504_p10, %p225_p11 }
  0x14   : > { %s231_s12 = sand.u32 (!%p226_p12), 1, %s637_s16  }
  0x15   : > { %229 = sbr.rel (%p226_p12) target bundleno = 213 (0xd5), region = 32  ;;  %s505_s13 = sshll.u32 (!%p226_p12), %s231_s12, 3 }
  0x16   : > { %s232_s14 = scalar_lea.sflag (!%p226_p12), [#allocation5], %s231_s12  ;;  %s235_s15 = scalar_lea.vmem (!%p226_p12), [#allocation4], %s505_s13 }
  0x1a   : > { %628 = dma.done.wait (%p724_p7), %s232_s14, 128  }
  0x1b   : > { %630 = vsyncadd (%p724_p7), %s232_s14, 4294967168  ;;  %p289_p13 = scmp.eq.s32.totalorder %s645_s18, 0 }
  0x1c   : > { %vm295_vm0 = vcmask (%p289_p13), 3072   ;;  %v655_v0 = vmov (%p289_p13), 0.0  }
  0x1d   : > { %294 = sbr.rel (!%p289_p13) target bundleno = 34 (0x22), region = 40  ;;  %296 = vst.msk [vmem:[#allocation2] sm:$0xf] (%p289_p13), %vm295_vm0, %v655_v0 }
  0x1e   : > { %297 = vst.msk [vmem:[#allocation3] sm:$0xf] (%p289_p13), %vm295_vm0, %v655_v0 }
  0x22 PF: > { %v298_v1 = vld [vmem:[%s235_s15] sm:$0xff]  ;;  %vm306_vm1 = vcmask 1043456   ;;  %p330_p0 = scmp.eq.s32.totalorder %s645_s18, 1  ;;  %vm313_vm2 = vcmask 3072  }
  0x23   : > { %301 = vst [vmem:[#allocation1] ss:$2 sm:$0xff] %v298_v1  ;;  %v316_v2 = vmul.f32 %v298_v1, %v298_v1  ;;  %v342_v32 = vld [vmem:[%s785_s1] sm:$0xf] (%p330_p0) }
  0x24   : > { %v299_v13 = vld [vmem:[#allocation2] sm:$0xf]  ;;  %v356_v36 = vld [vmem:[%s786_s2] sm:$0xf] (%p330_p0) }
  0x25   : > { %v315_v16 = vld [vmem:[#allocation3] sm:$0xf] }
  0x2a   : > { %v302_v3 = vld.sshfl [vmem:[#allocation1] sm:$0xff pattern:$0x75316420]  ;;  %v303_v4 = vld.sshfl [vmem:[#allocation1 + $0x8] sm:$0xff pattern:$0x75316420] }
  0x2b   : > { %v307_v5 = vsel %vm306_vm1, %v302_v3, 0.0  ;;  %v308_v6 = vsel %vm306_vm1, %v303_v4, 0.0  ;;  %318 = vst [vmem:[#allocation1] ss:$2 sm:$0xff] %v316_v2 }
  0x2c   : > { %v309_v7 = vadd.f32 %v308_v6, %v307_v5 }
  0x2e   : > { %310 = vadd.xlane.f32.xlu0 %v309_v7 }
  0x32   : > { %v319_v8 = vld.sshfl [vmem:[#allocation1] sm:$0xff pattern:$0x75316420]  ;;  %v320_v9 = vld.sshfl [vmem:[#allocation1 + $0x8] sm:$0xff pattern:$0x75316420] }
  0x33   : > { %v323_v10 = vsel %vm306_vm1, %v319_v8, 0.0  ;;  %v324_v11 = vsel %vm306_vm1, %v320_v9, 0.0 }
  0x34   : > { %v325_v12 = vadd.f32 %v324_v11, %v323_v10 }
  0x36   : > { %326 = vadd.xlane.f32.xlu0 %v325_v12 }
  0xa1   : > { %v311_v14 = vpop.xlane.xlu0 %310 }
  0xa2   : > { %v312_v15 = vadd.f32 %v311_v14, %v299_v13 }
  0xa4   : > { %314 = vst.msk [vmem:[#allocation2] sm:$0xf] %vm313_vm2, %v312_v15 }
  0xa8   : > { %334 = sbr.rel (!%p330_p0) target bundleno = 213 (0xd5), region = 44 }
  0xa9   : > { %v327_v17 = vpop.xlane.xlu0 %326 }
  0xaa   : > { %v328_v18 = vadd.f32 %v327_v17, %v315_v16 }
  0xab   : > { %v335_v19 = vld [vmem:[#allocation2] sm:$0xf] (%p330_p0) }
  0xac   : > { %329 = vst.msk [vmem:[#allocation3] sm:$0xf] %vm313_vm2, %v328_v18  ;;  %v336_v21 = vmul.f32 (%p330_p0), 0.001953125, %v335_v19 }
  0xae   : > { %v339_v23 = vmul.f32 %v336_v21, %v336_v21 }
  0xb3   : > { %v337_v20 = vld [vmem:[#allocation3] sm:$0xf] }
  0xb4   : > { %v338_v22 = vmul.f32 0.001953125, %v337_v20 }
  0xb6   : > { %v340_v24 = vsub.f32 %v338_v22, %v339_v23 }
  0xb8   : > { %v341_v25 = vmax.f32 %v340_v24, 0.0 }
  0xba   : > { %v343_v26 = vadd.f32 1e-05, %v341_v25 }
  0xbc   : > { %571 = vrsqrt.f32 %v343_v26  ;;  %vm350_vm3 = vweird.f32 %v343_v26 }
  0xc2   : > { %v572_v27 = vpop.eup %571 }
  0xc3   : > { %v345_v28 = vmul.f32 %v572_v27, %v343_v26  ;;  %vm351_vm4 = vweird.f32 %v572_v27 }
  0xc4   : > { %vm352_vm5 = vmor %vm350_vm3, %vm351_vm4 }
  0xc5   : > { %v346_v29 = vmul.f32 %v572_v27, %v345_v28 }
  0xc7   : > { %v347_v30 = vmul.f32 0.5, %v346_v29 }
  0xc9   : > { %v348_v31 = vsub.f32 1.5, %v347_v30 }
  0xcb   : > { %v349_v33 = vmul.f32 %v572_v27, %v348_v31 }
  0xcd   : > { %v353_v34 = vsel %vm352_vm5, %v572_v27, %v349_v33 }
  0xce   : > { %v354_v35 = vmul.f32 %v353_v34, %v342_v32 }
  0xd0   : > { %355 = vst.msk [vmem:[%s787_s3] sm:$0xf] %vm313_vm2, %v354_v35  ;;  %v357_v37 = vmul.f32 %v354_v35, %v336_v21 }
  0xd2   : > { %v358_v38 = vsub.f32 %v356_v36, %v357_v37 }
  0xd4   : > { %359 = vst.msk [vmem:[%s788_s4] sm:$0xf] %vm313_vm2, %v358_v38 }
  0xd5 PF: > { %s18_s20 = sadd.s32 1, %s653_s20   ;;  %s791_s15 = smov %s637_s16 }
  0xd6   : > { %p15_p1 = scmp.ge.s32.totalorder %s18_s20, 4   ;;  %s792_s16 = smov %s641_s17 }
  0xd7   : > { %s793_s17 = smov %s730_s27  ;;  %s794_s18 = smov %s649_s19 }
  0xd8   : > { %s795_s19 = smov %s797_s22  ;;  %17 = sbr.rel (!%p15_p1) target bundleno = 4 (0x4), region = 98 }
  0xdd   :  { %393 = vsyncpa [#allocation5], 1 }
  0xde   :  { %395 = vsyncpa [#allocation5 + $0x1], 1 }

</bundles_post_ra>
